<compile_context>
chip_gen: v7x
topology: tpu7x:2x2x1
jax: 0.10.0
libtpu: 0.0.40
codegen_flags: <defaults>
</compile_context>

<pallas_src>
from functools import partial

import jax
import jax.numpy as jnp
from jax.experimental import pallas as pl
from jax.experimental.pallas import tpu as pltpu


def _round_up(n, m):
    return -(-n // m) * m


def _sublane_quantum(dtype):
    # f32 -> 8, bf16 -> 16, int8/fp8 -> 32 (second-minor tiling quantum).
    return max(8, 32 // jnp.dtype(dtype).itemsize)


def _prefer_wide_n():
    """tn=256 only pays off on the 256-wide-MXU generations (v6e / v7x)."""
    try:
        kind = jax.devices()[0].device_kind.lower()
    except Exception:
        return True
    return ("v6" in kind) or ("v7" in kind)


def _gemm_bias_kernel(x_ref, w_ref, b_ref, o_ref):
    # x_ref: (TM, Kp)  im2col activation tile
    # w_ref: (Kp, TN)  folded conv weight tile
    # b_ref: (1, TN)   f32 bias tile
    # o_ref: (TM, TN)  output tile
    acc = jnp.dot(x_ref[...], w_ref[...], preferred_element_type=jnp.float32)
    o_ref[...] = (acc + b_ref[...]).astype(o_ref.dtype)


def _conv_gemm(x_col, w2, b2, out_dtype, *, tm, tn, n_inner):
    """Tiled GEMM + bias epilogue.  x_col:(Mp,Kp), w2:(Kp,Np), b2:(1,Np)."""
    mp, kp = x_col.shape
    _, np_ = w2.shape
    num_m = mp // tm
    num_n = np_ // tn

    if n_inner:
        # grid = (num_m, num_n), N innermost: activation block is constant along
        # the inner axis -> activations read from HBM once, weights re-streamed
        # num_m times (weights are the smaller operand in this regime).
        grid = (num_m, num_n)
        x_map = lambda i, j: (i, 0)
        w_map = lambda i, j: (0, j)
        o_map = lambda i, j: (i, j)
    else:
        # grid = (num_n, num_m), M innermost: weight block is constant along the
        # inner axis -> weights read once, activations re-streamed num_n times
        # (small-M inference regime).
        grid = (num_n, num_m)
        x_map = lambda j, i: (i, 0)
        w_map = lambda j, i: (0, j)
        o_map = lambda j, i: (i, j)

    grid_spec = pltpu.PrefetchScalarGridSpec(
        num_scalar_prefetch=0,
        grid=grid,
        in_specs=[
            pl.BlockSpec((tm, kp), x_map),   # activations
            pl.BlockSpec((kp, tn), w_map),   # folded weight
            pl.BlockSpec((1, tn), w_map),    # bias (same block index as weight)
        ],
        out_specs=pl.BlockSpec((tm, tn), o_map),
    )

    return pl.pallas_call(
        _gemm_bias_kernel,
        out_shape=jax.ShapeDtypeStruct((mp, np_), out_dtype),
        grid_spec=grid_spec,
        compiler_params=pltpu.CompilerParams(
            dimension_semantics=("parallel", "parallel")),
    )(x_col, w2, b2)


@partial(jax.jit, static_argnames=("compute_dtype",))
def downsample1d_nwc(x_btc, weight_oiw, bias, *, compute_dtype=None):
    """Channels-last Downsample1d.

    x_btc:      (B, T, C_in)
    weight_oiw: (C_out, C_in, 3)   (PyTorch Conv1d layout)
    bias:       (C_out,)
    returns     (B, T_out, C_out),  T_out = (T + 2 - 3)//2 + 1

    compute_dtype=None defaults to bf16 MXU inputs when x is f32 (f32
    accumulate / bias / store); pass jnp.float32 for an exact path.
    """
    B, T, C_in = x_btc.shape
    C_out, c_in_w, ksz = weight_oiw.shape
    assert c_in_w == C_in and ksz == 3
    T_out = (T + 2 - 3) // 2 + 1
    out_dtype = x_btc.dtype

    if compute_dtype is None:
        cdt = jnp.bfloat16 if x_btc.dtype == jnp.float32 else x_btc.dtype
    else:
        cdt = jnp.dtype(compute_dtype)

    # Cast before im2col so the staging buffer is built at compute precision.
    x = x_btc.astype(cdt)
    w2 = jnp.transpose(weight_oiw, (2, 1, 0)).reshape(3 * C_in, C_out).astype(cdt)
    b2 = bias.reshape(1, C_out).astype(jnp.float32)

    # --- im2col (fuses under jit; contiguous strided slices only) ---
    x_pad = jnp.pad(x, ((0, 0), (1, 1), (0, 0)))                 # (B, T+2, C)
    taps = [x_pad[:, k::2, :][:, :T_out, :] for k in range(3)]   # 3 x (B, T_out, C)
    x_col = jnp.concatenate(taps, axis=-1).reshape(B * T_out, 3 * C_in)

    M, K = x_col.shape
    Kp = _round_up(K, 128)

    # --- N tiling: lane-dense, MXU-width-aware ---
    tn = 256 if (C_out > 128 and C_out % 256 == 0 and _prefer_wide_n()) else 128
    Np = _round_up(C_out, tn)
    num_n = Np // tn

    # --- M tiling: no forced 128 minimum; cap tile height; keep every tile a
    # sublane multiple; split M in two if the grid would otherwise be 1x1 so
    # both v7x TensorCores get work. ---
    sub_m = max(_sublane_quantum(cdt), _sublane_quantum(out_dtype))
    cap = 512
    num_m = max(1, -(-M // cap))
    if num_n == 1 and num_m == 1 and M >= 2 * sub_m:
        num_m = 2
    tm = _round_up(-(-M // num_m), sub_m)
    Mp = num_m * tm

    x_col = jnp.pad(x_col, ((0, Mp - M), (0, Kp - K)))
    w2 = jnp.pad(w2, ((0, Kp - K), (0, Np - C_out)))
    b2 = jnp.pad(b2, ((0, 0), (0, Np - C_out)))

    # Stream the smaller operand along the inner grid axis; the bigger one is
    # read from HBM exactly once.
    n_inner = (Kp * Np) <= (Mp * Kp)

    y = _conv_gemm(x_col, w2, b2, out_dtype, tm=tm, tn=tn, n_inner=n_inner)
    return y[:M, :C_out].reshape(B, T_out, C_out)


@partial(jax.jit, static_argnames=("compute_dtype",))
def downsample1d(x_ncw, weight_oiw, bias, *, compute_dtype=None):
    """PyTorch-layout wrapper: x (B, C, T) -> (B, C, T_out)."""
    y_btc = downsample1d_nwc(jnp.transpose(x_ncw, (0, 2, 1)), weight_oiw, bias,
                             compute_dtype=compute_dtype)
    return jnp.transpose(y_btc, (0, 2, 1))


if __name__ == "__main__":
    key = jax.random.PRNGKey(0)

    def ref_conv(x, w, b):
        y = jax.lax.conv_general_dilated(
            x, w, window_strides=(2,), padding=((1, 1),),
            dimension_numbers=("NCH", "OIH", "NCH"))
        return y + b[None, :, None]

    # --- test 1: tiny module shapes (Downsample1d(dim=4)), exact f32 path ---
    B, C, T = 2, 4, 16
    k1, k2, k3, key = jax.random.split(key, 4)
    x = jax.random.normal(k1, (B, C, T), jnp.float32)
    bound = 1.0 / (C * 3) ** 0.5
    w = jax.random.uniform(k2, (C, C, 3), jnp.float32, -bound, bound)
    b = jax.random.uniform(k3, (C,), jnp.float32, -bound, bound)

    y_ref = ref_conv(x, w, b)
    y_f32 = jax.block_until_ready(downsample1d(x, w, b, compute_dtype=jnp.float32))
    assert y_f32.shape == (B, C, (T + 2 - 3) // 2 + 1)
    assert jnp.allclose(y_f32, y_ref, atol=1e-5, rtol=1e-5), \
        float(jnp.abs(y_f32 - y_ref).max())

    # --- test 2: same shapes, default path (bf16 MXU inputs, f32 accumulate) ---
    y_bf = jax.block_until_ready(downsample1d(x, w, b))
    assert y_bf.dtype == x.dtype
    assert jnp.allclose(y_bf, y_ref, atol=3e-2, rtol=3e-2), \
        float(jnp.abs(y_bf - y_ref).max())

    # --- test 3: lane-dense channels, odd T ---
    B2, C2, T2 = 2, 128, 33
    k1, k2, k3, key = jax.random.split(key, 4)
    x2 = jax.random.normal(k1, (B2, C2, T2), jnp.float32)
    bound2 = 1.0 / (C2 * 3) ** 0.5
    w2t = jax.random.uniform(k2, (C2, C2, 3), jnp.float32, -bound2, bound2)
    b2t = jax.random.uniform(k3, (C2,), jnp.float32, -bound2, bound2)
    y2_ref = ref_conv(x2, w2t, b2t)

    y2_f32 = jax.block_until_ready(downsample1d(x2, w2t, b2t, compute_dtype=jnp.float32))
    assert y2_f32.shape == (B2, C2, (T2 + 2 - 3) // 2 + 1)
    assert jnp.allclose(y2_f32, y2_ref, atol=1e-4, rtol=1e-4), \
        float(jnp.abs(y2_f32 - y2_ref).max())

    y2_bf = jax.block_until_ready(downsample1d(x2, w2t, b2t))
    assert jnp.allclose(y2_bf, y2_ref, atol=5e-2, rtol=5e-2), \
        float(jnp.abs(y2_bf - y2_ref).max())

    print("KERNEL_OK")
</pallas_src>

<mosaic_0001>
module attributes {stable_mosaic.version = 11 : i64} {
  func.func @_gemm_bias_kernel(%arg0: i32, %arg1: i32, %arg2: memref<8x128xf32, #tpu.memory_space<vmem>>, %arg3: memref<128x128xf32, #tpu.memory_space<vmem>>, %arg4: memref<1x128xf32, #tpu.memory_space<vmem>>, %arg5: memref<8x128xf32, #tpu.memory_space<vmem>>) attributes {dimension_semantics = [#tpu.dimension_semantics<parallel>, #tpu.dimension_semantics<parallel>], iteration_bounds = array<i64: 1, 2>, scalar_prefetch = 0 : i64, scratch_operands = 0 : i64, tpu.core_type = #tpu.core_type<tc>, window_params = [{transform_indices = @transform_0, window_bounds = array<i64: 8, 128>}, {transform_indices = @transform_1, window_bounds = array<i64: 128, 128>}, {transform_indices = @transform_2, window_bounds = array<i64: 1, 128>}, {transform_indices = @transform_3, window_bounds = array<i64: 8, 128>}]} {
    %c0 = arith.constant 0 : index
    %c0_0 = arith.constant 0 : index
    %0 = vector.load %arg2[%c0, %c0_0] : memref<8x128xf32, #tpu.memory_space<vmem>>, vector<8x128xf32>
    %c0_1 = arith.constant 0 : index
    %c0_2 = arith.constant 0 : index
    %1 = vector.load %arg3[%c0_1, %c0_2] : memref<128x128xf32, #tpu.memory_space<vmem>>, vector<128x128xf32>
    %cst = arith.constant dense<0.000000e+00> : vector<8x128xf32>
    %2 = tpu.matmul %0, %1, %cst {dimension_numbers = #tpu.dot_dimension_numbers<[1], [0], [0], [1], [0, 0, 1, 1], [], []>} : vector<8x128xf32>, vector<128x128xf32>, vector<8x128xf32> -> vector<8x128xf32>
    %c0_3 = arith.constant 0 : index
    %c0_4 = arith.constant 0 : index
    %3 = vector.load %arg4[%c0_3, %c0_4] : memref<1x128xf32, #tpu.memory_space<vmem>>, vector<1x128xf32>
    %4 = vector.broadcast %3 : vector<1x128xf32> to vector<8x128xf32>
    %5 = arith.addf %2, %4 : vector<8x128xf32>
    %c0_5 = arith.constant 0 : index
    %c0_6 = arith.constant 0 : index
    %6 = vector.load %arg5[%c0_5, %c0_6] : memref<8x128xf32, #tpu.memory_space<vmem>>, vector<8x128xf32>
    tpu.vector_store %arg5[%c0_5, %c0_6], %5 {strides = array<i32>} : memref<8x128xf32, #tpu.memory_space<vmem>>, vector<8x128xf32>,
    return
  }
  func.func @transform_0(%arg0: i32, %arg1: i32) -> (i32, i32) {
    %c0_i32 = arith.constant 0 : i32
    %c0_i32_0 = arith.constant 0 : i32
    return %arg1, %c0_i32 : i32, i32
  }
  func.func @transform_1(%arg0: i32, %arg1: i32) -> (i32, i32) {
    %c0_i32 = arith.constant 0 : i32
    %c0_i32_0 = arith.constant 0 : i32
    return %c0_i32, %arg0 : i32, i32
  }
  func.func @transform_2(%arg0: i32, %arg1: i32) -> (i32, i32) {
    %c0_i32 = arith.constant 0 : i32
    %c0_i32_0 = arith.constant 0 : i32
    return %c0_i32, %arg0 : i32, i32
  }
  func.func @transform_3(%arg0: i32, %arg1: i32) -> (i32, i32) {
    %c0_i32 = arith.constant 0 : i32
    return %arg1, %arg0 : i32, i32
  }
}

</mosaic_0001>

<bundles_post_ra>
// kernel: downsample1d_nwc.1
= control target key start
LH: loop header
LB: loop body
LE: loop exit
PB: predicated region body
PF: predicated region fallthrough
CT: control target
= control target key end

     0   :  { %s573_s12 = smov 0   ;;  %s575_s13 = smov 0   ;;  %s661_s0 = inlined_call_operand.vmem [shape: f32[16,128], index: 0, kind: input, shape index: {}]   ;;  %s662_s1 = inlined_call_operand.vmem [shape: f32[128,128], index: 1, kind: input, shape index: {}]   ;;  %s663_s2 = inlined_call_operand.vmem [shape: f32[1,128], index: 2, kind: input, shape index: {}]   ;;  %s664_s3 = inlined_call_operand.vmem [shape: f32[16,128], index: 3, kind: output, shape index: {}]  }
   0x1   :  { %s577_s14 = smov 0  }
   0x2 LB: > { %s22_s15 = sadd.s32 1, %s544_s13  ;;  %p417_p0 = scmp.ge.s32.totalorder %s548_s14, 1  ;;  %s548_s14 = sphi %s577_s14, %s13_s14   ;;  %s544_s13 = sphi %s575_s13, %s666_s13   ;;  %s540_s12 = sphi %s573_s12, %s665_s12  }
   0x3   : > { %p23_p1 = scmp.ge.s32.totalorder %s22_s15, 2  ;;  %p167_p2 = scmp.lt.s32.totalorder %s548_s14, 3 }
   0x5   : > { %s668_s15 = smov (%p23_p1, %s22_s15), 0  ;;  %p168_p3 = pnand %p417_p0, %p167_p2 }
   0x6   : > { %v218_v0 = vld [vmem:[%s662_s1] sm:$0xff] (!%p168_p3)  ;;  %v219_v1 = vld [vmem:[%s662_s1 + $0x8] sm:$0xff] (!%p168_p3)  ;;  %v220_v2 = vld [vmem:[%s662_s1 + $0x10] sm:$0xff] (!%p168_p3)  ;;  %v550_v3 = vmov (!%p168_p3), 0.0|0.0   ;;  %vm551_vm0 = vmmov (!%p168_p3), 0   ;;  %v552_v6 = vmov (!%p168_p3), 0.0  }
   0x7   : > { %171 = sbr.rel (%p168_p3) target bundleno = 255 (0xff), region = 32  ;;  %475 = vmatprep.subr.bf16.mxu0 (!%p168_p3), %v550_v3  ;;  %v476_v4 = vpack.c.bf16 (!%p168_p3), %v219_v1, %v218_v0  ;;  %v221_v5 = vld [vmem:[%s662_s1 + $0x18] sm:$0xff] (!%p168_p3)  ;;  %472 = vmatprep.mubr.msk.f32.mxu0 (!%p168_p3), %vm551_vm0, %v552_v6  ;;  %v222_v8 = vld [vmem:[%s662_s1 + $0x20] sm:$0xff] (!%p168_p3)  ;;  %v223_v9 = vld [vmem:[%s662_s1 + $0x28] sm:$0xff] (!%p168_p3)  ;;  %p199_p4 = scmp.lt.s32.totalorder (!%p168_p3), %s540_s12, 1 }
   0x8   : > { %v479_v7 = vpack.c.bf16 (!%p168_p3), %v221_v5, %v220_v2  ;;  %v482_v10 = vpack.c.bf16 (!%p168_p3), %v223_v9, %v222_v8  ;;  %v224_v11 = vld [vmem:[%s662_s1 + $0x30] sm:$0xff] (!%p168_p3)  ;;  %v225_v12 = vld [vmem:[%s662_s1 + $0x38] sm:$0xff] (!%p168_p3)  ;;  %v226_v14 = vld [vmem:[%s662_s1 + $0x40] sm:$0xff] (!%p168_p3) }
   0x9   : > { %477 = vmatpush3.bf16.msra.mxu0 (!%p168_p3), %v476_v4  ;;  %v485_v13 = vpack.c.bf16 (!%p168_p3), %v225_v12, %v224_v11  ;;  %v227_v15 = vld [vmem:[%s662_s1 + $0x48] sm:$0xff] (!%p168_p3)  ;;  %v228_v17 = vld [vmem:[%s662_s1 + $0x50] sm:$0xff] (!%p168_p3)  ;;  %v229_v18 = vld [vmem:[%s662_s1 + $0x58] sm:$0xff] (!%p168_p3) }
   0xa   : > { %478 = vmatprep.subr.bf16.mxu0 (!%p168_p3), %v550_v3  ;;  %v488_v16 = vpack.c.bf16 (!%p168_p3), %v227_v15, %v226_v14  ;;  %v491_v19 = vpack.c.bf16 (!%p168_p3), %v229_v18, %v228_v17  ;;  %v230_v20 = vld [vmem:[%s662_s1 + $0x60] sm:$0xff] (!%p168_p3)  ;;  %v231_v21 = vld [vmem:[%s662_s1 + $0x68] sm:$0xff] (!%p168_p3)  ;;  %v232_v23 = vld [vmem:[%s662_s1 + $0x70] sm:$0xff] (!%p168_p3) }
   0xb   : > { %v494_v22 = vpack.c.bf16 (!%p168_p3), %v231_v21, %v230_v20  ;;  %v233_v24 = vld [vmem:[%s662_s1 + $0x78] sm:$0xff] (!%p168_p3)  ;;  %v420_v27 = vld [vmem:[%s663_s2] ss:$0 sm:$0xff] (!%p168_p3) }
   0xc   : > { %v497_v25 = vpack.c.bf16 (!%p168_p3), %v233_v24, %v232_v23 }
   0xd   : > { %480 = vmatpush3.bf16.msra.mxu0 (!%p168_p3), %v479_v7 }
   0xe   : > { %481 = vmatprep.subr.bf16.mxu0 %v550_v3  ;;  %s670_s12 = smov (!%p199_p4, %s540_s12), 1 }
   0xf   : > { %s418_s25 = sshll.u32 %s670_s12, 3 }
  0x10   : > { %s202_s28 = scalar_lea.vmem %s661_s0, %s418_s25  ;;  %s216_s6 = scalar_lea.vmem %s664_s3, %s418_s25 }
  0x11   : > { %483 = vmatpush3.bf16.msra.mxu0 %v482_v10  ;;  %v217_v26 = vld [vmem:[%s202_s28] sm:$0xff] }
  0x12   : > { %484 = vmatprep.subr.bf16.mxu0 %v550_v3 }
  0x15   : > { %486 = vmatpush3.bf16.msra.mxu0 %v485_v13 }
  0x16   : > { %487 = vmatprep.subr.bf16.mxu0 %v550_v3 }
  0x19   : > { %489 = vmatpush3.bf16.msra.mxu0 %v488_v16 }
  0x1a   : > { %490 = vmatprep.subr.bf16.mxu0 %v550_v3 }
  0x1d   : > { %492 = vmatpush3.bf16.msra.mxu0 %v491_v19 }
  0x1e   : > { %493 = vmatprep.subr.bf16.mxu0 %v550_v3 }
  0x21   : > { %495 = vmatpush3.bf16.msra.mxu0 %v494_v22 }
  0x22   : > { %496 = vmatprep.subr.bf16.mxu0 %v550_v3 }
  0x25   : > { %498 = vmatpush3.bf16.msra.mxu0 %v497_v25 }
  0x28   : > { %473 = vmatmul.mubr.f32.vlgmr.msra.gmra.mrb[0].mxu0 %v217_v26 }
  0xfb   : > { %v307_v28 = vpop.f32.mrb[0].mxu0 }
  0xfc   : > { %v308_v29 = vadd.f32 %v420_v27, %v307_v28  ;;  %v474_v30 = vpop.f32.mrb[1].mxu0 }
  0xfe   : > { %311 = vst [vmem:[%s216_s6] sm:$0xff] %v308_v29 }
  0xff PF: > { %s13_s14 = sadd.s32 1, %s548_s14   ;;  %s665_s12 = smov %s544_s13 }
 0x100   : > { %p10_p5 = scmp.ge.s32.totalorder %s13_s14, 4   ;;  %s666_s13 = smov %s668_s15 }
 0x102   :  { %12 = sbr.rel (!%p10_p5) target bundleno = 2 (0x2), region = 68 }

</bundles_post_ra>
